<compile_context>
chip_gen: v5e
topology: v5e:2x2
jax: 0.10.0
libtpu: 0.0.40
codegen_flags: <defaults>
</compile_context>

<pallas_src>
import jax
import jax.numpy as jnp
from jax.experimental import pallas as pl
from jax.experimental.pallas import tpu as pltpu


# --------------------------------------------------------------------------- #
# Sizing helpers
# --------------------------------------------------------------------------- #
def _vmem_limit_bytes() -> int:
    """Per-generation VMEM budget (v5e/v6e: 128 MiB, v7x: 64 MiB physical)."""
    try:
        cap = int(getattr(pltpu.get_tpu_info(), "vmem_capacity_bytes", 0))
        if cap > 0:
            return min(cap // 2, 64 * 1024 * 1024)
    except Exception:
        pass
    return 32 * 1024 * 1024  # conservative default, safe on all generations


def _pick_token_tile(nbs: int, repeat: int, embed_dim: int, itemsize: int,
                     budget_bytes: int, row_align: int,
                     max_rows_cap: int = 2048) -> int:
    """Largest aligned divisor of `nbs` whose double-buffered output block fits
    the budget (big tiles -> fewer grid steps, longer HBM writeback bursts)."""
    bytes_per_row = repeat * embed_dim * itemsize
    max_rows = max(row_align, budget_bytes // (2 * bytes_per_row))
    max_rows = min(max_rows, max_rows_cap)
    if nbs <= max_rows:
        return nbs
    for t in range(int(min(max_rows, nbs)), row_align - 1, -1):
        if nbs % t == 0 and t % row_align == 0:
            return t
    # TODO(synk): ragged last tile when NBS has no aligned divisor <= max_rows.
    return nbs  # full extent is always a legal block


# --------------------------------------------------------------------------- #
# Kernels
# --------------------------------------------------------------------------- #
def _make_vmem_table_kernel(nbs: int, token_tile: int, repeat: int):
    """Fast path: embedding table resident in VMEM; gather = dynamic VMEM reads."""

    def kernel(tok_ref, emb_ref, out_ref):
        # tok_ref : SMEM (B*NBS,) int32      scalar-prefetched token ids
        # emb_ref : VMEM (V, E)              table (constant index_map: loaded once)
        # out_ref : VMEM (R, token_tile, E)  output block for (b, tile i)
        b = pl.program_id(0)
        i = pl.program_id(1)
        base = b * nbs + i * token_tile

        @pl.loop(0, token_tile)
        def _gather(t):
            tok = tok_ref[base + t]
            out_ref[0, pl.ds(t, 1), :] = emb_ref[pl.ds(tok, 1), :]

        # Repeats are pure full-vreg block copies (R = context_size - 1 is a
        # small static Python int, so this unrolls).
        for r in range(1, repeat):
            out_ref[r] = out_ref[0]

    return kernel


def _make_hbm_table_kernel(nbs: int, token_tile: int, repeat: int):
    """Large-vocab path: table stays in HBM; per-row gather DMAs into the output
    block with a single aggregated wait per tile."""

    def kernel(tok_ref, emb_ref, out_ref, sem_ref):
        # tok_ref : SMEM (B*NBS,) int32
        # emb_ref : HBM  (V, E)              memory_space=pl.ANY
        # out_ref : VMEM (R, token_tile, E)
        # sem_ref : single DMA semaphore shared by all row copies of this tile
        b = pl.program_id(0)
        i = pl.program_id(1)
        base = b * nbs + i * token_tile

        @pl.loop(0, token_tile)
        def _issue(t):
            tok = tok_ref[base + t]
            pltpu.make_async_copy(
                emb_ref.at[pl.ds(tok, 1), :],
                out_ref.at[0, pl.ds(t, 1), :],
                sem_ref,
            ).start()

        # One aggregated wait: every row copy signals sem_ref, and this
        # descriptor's byte count (token_tile * E rows) equals their sum.
        pltpu.make_async_copy(out_ref.at[0], out_ref.at[0], sem_ref).wait()

        for r in range(1, repeat):
            out_ref[r] = out_ref[0]

    return kernel


# --------------------------------------------------------------------------- #
# Wrapper
# --------------------------------------------------------------------------- #
def skipgram_forward(tokens, emb_table, context_size, *, token_tile=None,
                     force_hbm_table=False):
    """tokens: (B, NB, S) int; emb_table: (V, E) float.

    Returns (B, NB*(context_size-1), S, E), matching the PyTorch module.
    """
    B, NB, S = tokens.shape
    V, E = emb_table.shape
    R = context_size - 1
    assert R >= 1, "context_size must be >= 2"
    NBS = NB * S

    dtype = emb_table.dtype
    itemsize = jnp.dtype(dtype).itemsize
    row_align = 8 if itemsize >= 4 else (16 if itemsize == 2 else 32)

    vmem_limit = _vmem_limit_bytes()

    if token_tile is None:
        token_tile = _pick_token_tile(NBS, R, E, itemsize,
                                      max(vmem_limit // 4, 1 << 20), row_align)
    assert NBS % token_tile == 0, "token_tile must divide neighbor_size * n_subseq"
    assert token_tile == NBS or token_tile % row_align == 0, \
        "token_tile must be sublane-aligned or equal to the full extent"
    n_tiles = NBS // token_tile

    # Flat 1-D token array in SMEM (avoids 2-D SMEM row padding).
    tok_flat = tokens.reshape(B * NBS).astype(jnp.int32)
    # TODO(synk): clamp/validate token ids; PyTorch raises on OOB ids, here the
    # HBM path faults and the VMEM path silently reads garbage.

    out_block_bytes = R * token_tile * E * itemsize
    table_bytes = V * E * itemsize
    use_vmem_table = (not force_hbm_table) and (
        2 * table_bytes + 2 * out_block_bytes + (1 << 20) <= vmem_limit)

    # Kernel-side output layout (B, R, NBS, E): each grid step writes one
    # contiguous HBM slab; wrapper reshapes back to the PyTorch layout.
    # TODO(synk): pad E (or fold S into the last dim) for lane-dense stores when
    # E is not a multiple of 128; correctness is unaffected.
    out_spec = pl.BlockSpec((None, R, token_tile, E),
                            lambda b, i, tok: (b, 0, i, 0))

    if use_vmem_table:
        kernel = _make_vmem_table_kernel(NBS, token_tile, R)
        in_specs = [pl.BlockSpec((V, E), lambda b, i, tok: (0, 0))]  # fetched once
        scratch_shapes = []
        gather_bytes = table_bytes
    else:
        kernel = _make_hbm_table_kernel(NBS, token_tile, R)
        in_specs = [pl.BlockSpec(memory_space=pl.ANY)]               # stays in HBM
        scratch_shapes = [pltpu.SemaphoreType.DMA]
        gather_bytes = B * NBS * E * itemsize

    out_bytes = B * R * NBS * E * itemsize
    cost = pl.CostEstimate(flops=0, transcendentals=0,
                           bytes_accessed=out_bytes + gather_bytes + B * NBS * 4)

    out = pl.pallas_call(
        kernel,
        out_shape=jax.ShapeDtypeStruct((B, R, NBS, E), dtype),
        grid_spec=pltpu.PrefetchScalarGridSpec(
            num_scalar_prefetch=1,                 # token ids -> SMEM
            grid=(B, n_tiles),
            in_specs=in_specs,
            out_specs=out_spec,
            scratch_shapes=scratch_shapes,
        ),
        compiler_params=pltpu.CompilerParams(
            dimension_semantics=("parallel", "parallel"),
            vmem_limit_bytes=vmem_limit,
        ),
        cost_estimate=cost,
    )(tok_flat, emb_table)

    # (B, R, NB*S, E) -> (B, R*NB, S, E): contiguous reshape; axis-1 index is
    # j = r*NB + nb, identical to torch .repeat(1, R, 1, 1).
    return out.reshape(B, R * NB, S, E)


# --------------------------------------------------------------------------- #
# Demo / self-test
# --------------------------------------------------------------------------- #
if __name__ == "__main__":
    vocab_size = 256
    embed_dim = 128           # multiple of 128 -> lane-dense stores
    context_size = 3          # repeat factor R = context_size - 1 = 2
    padding_idx = 0           # NlpContext default padding index

    batch = 2
    neighbor_size = 4
    n_subseq = 8

    key = jax.random.PRNGKey(0)
    k_emb, k_tok = jax.random.split(key)

    # Deterministic embedding table; zero the padding row like nn.Embedding.
    emb_table = jax.random.normal(k_emb, (vocab_size, embed_dim), jnp.float32)
    emb_table = emb_table.at[padding_idx].set(0.0)

    tokens = jax.random.randint(
        k_tok, (batch, neighbor_size, n_subseq), 0, vocab_size, jnp.int32)
    tokens = tokens.at[0, 0, 0].set(padding_idx)  # exercise the padding row

    # Pure-JAX reference: embedding lookup + repeat along the neighbor axis.
    ref = jnp.tile(emb_table[tokens], (1, context_size - 1, 1, 1))

    # Fast path: table resident in VMEM (default for this vocab size).
    out = jax.block_until_ready(skipgram_forward(tokens, emb_table, context_size))
    assert out.shape == (batch, neighbor_size * (context_size - 1),
                         n_subseq, embed_dim), out.shape
    assert jnp.allclose(out, ref, atol=1e-6, rtol=1e-6)

    # Large-vocab path: HBM table + per-row DMA gather with aggregated wait.
    out_hbm = jax.block_until_ready(
        skipgram_forward(tokens, emb_table, context_size, force_hbm_table=True))
    assert out_hbm.shape == ref.shape
    assert jnp.allclose(out_hbm, ref, atol=1e-6, rtol=1e-6)

    print("KERNEL_OK")
</pallas_src>

<mosaic_0001>
module attributes {stable_mosaic.version = 11 : i64} {
  func.func @kernel(%arg0: i32, %arg1: i32, %arg2: memref<64xi32, #tpu.memory_space<smem>>, %arg3: memref<256x128xf32, #tpu.memory_space<vmem>>, %arg4: memref<1x2x32x128xf32, #tpu.memory_space<vmem>>) attributes {dimension_semantics = [#tpu.dimension_semantics<parallel>, #tpu.dimension_semantics<parallel>], iteration_bounds = array<i64: 2, 1>, scalar_prefetch = 1 : i64, scratch_operands = 0 : i64, tpu.core_type = #tpu.core_type<tc>, window_params = [{pipeline_mode = #tpu.pipeline_mode<synchronous>, transform_indices = @transform_0, window_bounds = array<i64: 256, 128>}, {transform_indices = @transform_1, window_bounds = array<i64: 1, 2, 32, 128>}]} {
    %c32_i32 = arith.constant 32 : i32
    %0 = arith.muli %arg0, %c32_i32 : i32
    %c32_i32_0 = arith.constant 32 : i32
    %1 = arith.muli %arg1, %c32_i32_0 : i32
    %2 = arith.addi %0, %1 : i32
    %c0_i32 = arith.constant 0 : i32
    %c32_i32_1 = arith.constant 32 : i32
    %3 = arith.addi %c0_i32, %c32_i32_1 : i32
    %c1_i32 = arith.constant 1 : i32
    scf.for %arg5 = %c0_i32 to %3 step %c1_i32  : i32 {
      %c1_i32_9 = arith.constant 1 : i32
      %9 = arith.muli %arg5, %c1_i32_9 : i32
      %c0_i32_10 = arith.constant 0 : i32
      %10 = arith.addi %c0_i32_10, %9 : i32
      %11 = arith.addi %2, %10 : i32
      %12 = arith.index_cast %11 : i32 to index
      %13 = memref.load %arg2[%12] : memref<64xi32, #tpu.memory_space<smem>>
      %14 = arith.index_cast %13 : i32 to index
      %c0_11 = arith.constant 0 : index
      %15 = vector.load %arg3[%14, %c0_11] : memref<256x128xf32, #tpu.memory_space<vmem>>, vector<1x128xf32>
      %c0_12 = arith.constant 0 : index
      %c0_13 = arith.constant 0 : index
      %16 = arith.index_cast %10 : i32 to index
      %c0_14 = arith.constant 0 : index
      %17 = vector.load %arg4[%c0_12, %c0_13, %16, %c0_14] : memref<1x2x32x128xf32, #tpu.memory_space<vmem>>, vector<1x1x1x128xf32>
      %18 = vector.shape_cast %17 : vector<1x1x1x128xf32> to vector<1x128xf32>
      %19 = vector.shape_cast %15 : vector<1x128xf32> to vector<1x1x1x128xf32>
      tpu.vector_store %arg4[%c0_12, %c0_13, %16, %c0_14], %19 {strides = array<i32>} : memref<1x2x32x128xf32, #tpu.memory_space<vmem>>, vector<1x1x1x128xf32>,
    }
    %c32_i32_2 = arith.constant 32 : i32
    %c0 = arith.constant 0 : index
    %c0_3 = arith.constant 0 : index
    %c0_4 = arith.constant 0 : index
    %c0_5 = arith.constant 0 : index
    %4 = vector.load %arg4[%c0, %c0_3, %c0_4, %c0_5] : memref<1x2x32x128xf32, #tpu.memory_space<vmem>>, vector<1x1x32x128xf32>
    %5 = vector.shape_cast %4 : vector<1x1x32x128xf32> to vector<32x128xf32>
    %c0_6 = arith.constant 0 : index
    %c1 = arith.constant 1 : index
    %c0_7 = arith.constant 0 : index
    %c0_8 = arith.constant 0 : index
    %6 = vector.load %arg4[%c0_6, %c1, %c0_7, %c0_8] : memref<1x2x32x128xf32, #tpu.memory_space<vmem>>, vector<1x1x32x128xf32>
    %7 = vector.shape_cast %6 : vector<1x1x32x128xf32> to vector<32x128xf32>
    %8 = vector.shape_cast %5 : vector<32x128xf32> to vector<1x1x32x128xf32>
    tpu.vector_store %arg4[%c0_6, %c1, %c0_7, %c0_8], %8 {strides = array<i32>} : memref<1x2x32x128xf32, #tpu.memory_space<vmem>>, vector<1x1x32x128xf32>,
    return
  }
  func.func @transform_0(%arg0: i32, %arg1: i32, %arg2: memref<64xi32, #tpu.memory_space<smem>>) -> (i32, i32) {
    %c0_i32 = arith.constant 0 : i32
    %c0_i32_0 = arith.constant 0 : i32
    %c0_i32_1 = arith.constant 0 : i32
    return %c0_i32, %c0_i32_0 : i32, i32
  }
  func.func @transform_1(%arg0: i32, %arg1: i32, %arg2: memref<64xi32, #tpu.memory_space<smem>>) -> (i32, i32, i32, i32) {
    %c0_i32 = arith.constant 0 : i32
    %c0_i32_0 = arith.constant 0 : i32
    %c0_i32_1 = arith.constant 0 : i32
    return %arg0, %c0_i32, %arg1, %c0_i32_0 : i32, i32, i32, i32
  }
}

</mosaic_0001>

<bundles_post_ra>
// kernel: tpu_custom_call.1
= control target key start
LH: loop header
LB: loop body
LE: loop exit
PB: predicated region body
PF: predicated region fallthrough
CT: control target
= control target key end

     0   :  { %s491_s12 = smov [#allocation3]   ;;  %s615_s0 = inlined_call_operand.hbm [shape: s32[64], index: 0, kind: input, shape index: {}]   ;;  %s616_s1 = inlined_call_operand.hbm [shape: f32[256,128], index: 1, kind: input, shape index: {}]   ;;  %s617_s2 = inlined_call_operand.hbm [shape: f32[2,2,32,128], index: 2, kind: output, shape index: {}]  }
   0x1   :  { %s8_s11 = sshll.u32 %s615_s0, 4  ;;  %s9_s11 = int_to_ptr.hbm [resolvable:$true] %s8_s11 }
   0x2   :  { %11 = dma.hbm_to_smem %s9_s11, 16, %s491_s12, [#allocation2] }
   0x3   :  { %453 = dma.done.wait [#allocation2], 16 }
   0x4   :  { %454 = vsyncadd [#allocation2], 4294967280 }
   0x5   :  { %14 = sfence }
   0x6   :  { %15 = vsyncpa [#allocation5], 0 }
   0x7   :  { %16 = vsyncpa [#allocation6], 0 }
   0x8   :  { %18 = vsyncpa [#allocation6 + $0x1], 0  ;;  %s515_s13 = smov 0   ;;  %s517_s14 = smov 0  }
   0x9   :  { %s519_s15 = smov 0   ;;  %s521_s16 = smov 0  }
   0xa   :  { %s523_s17 = smov 0   ;;  %s525_s0 = smov 0  }
   0xb LB: > { %s258_s18 = sadd.s32 4294967295, %s485_s0   ;;  %s259_s19 = sadd.s32 4294967294, %s485_s0   ;;  %s485_s0 = sphi %s525_s0, %s24_s0   ;;  %s481_s17 = sphi %s523_s17, %s624_s17   ;;  %s477_s16 = sphi %s521_s16, %s623_s16   ;;  %s473_s15 = sphi %s519_s15, %s622_s15   ;;  %s469_s14 = sphi %s517_s14, %s621_s14   ;;  %s465_s13 = sphi %s515_s13, %s620_s13  }
   0xc   : > { %s36_s20 = sadd.s32 1, %s481_s17  ;;  %s66_s21 = sadd.s32 1, %s473_s15 }
   0xd   : > { %p38_p0 = scmp.ge.s32.totalorder %s36_s20, 2  ;;  %p76_p1 = scmp.ne.s32.totalorder %s473_s15, %s469_s14 }
   0xe   : > { %p77_p2 = scmp.eq.s32.totalorder %s258_s18, 1  ;;  %p82_p3 = scmp.ne.s32.totalorder %s469_s14, %s465_s13 }
   0xf   : > { %s626_s20 = smov (%p38_p0, %s36_s20), 0  ;;  %p83_p5 = scmp.eq.s32.totalorder %s259_s19, 1 }
  0x10   : > { %p555_p4 = por %p77_p2, %p76_p1  ;;  %s61_s23 = ssub.s32 %s481_s17, %s626_s20 }
  0x11   : > { %p260_p6 = scmp.ge.s32.totalorder %s485_s0, 1  ;;  %p64_p7 = scmp.eq.s32.totalorder %s61_s23, 0 }
  0x12   : > { %p562_p8 = por %p83_p5, %p82_p3  ;;  %p90_p9 = scmp.lt.s32.totalorder %s485_s0, 3 }
  0x13   : > { %s568_s25 = scalar_select %p64_p7, %s473_s15, %s66_s21  }
  0x14   : > { %p91_p10 = pnand %p260_p6, %p90_p9  ;;  %p290_p11 = scmp.eq.s32.totalorder %s258_s18, 0 }
  0x15   : > { %s101_s28 = sshll.u32 %s616_s1, 4  ;;  %s492_s29 = smov [#allocation4]   ;;  %s102_s28 = int_to_ptr.hbm [resolvable:$true] %s101_s28 }
  0x16   : > { %p282_p12 = pneg %p91_p10  ;;  %s103_s30 = sshll.u32 %s492_s29, 4  ;;  %s104_s30 = int_to_ptr.vmem [resolvable:$true] %s103_s30 }
  0x17   : > { %s493_s3 = smov 128   ;;  %s494_s4 = smov 8  }
  0x18   : > { %p283_p13 = pnand %p290_p11, %p282_p12  ;;  %119 = sbr.rel (%p91_p10) target bundleno = 57 (0x39), region = 24 }
  0x1a   : > { %285 = dma.hbm_to_vmem [thread:$0]  (!%p283_p13), %s102_s28, 4096, %s104_s30, [#allocation5], %s493_s3, %s493_s3, %s494_s4  }
  0x1d   : > { %456 = dma.done.wait (%p290_p11), [#allocation5], 4096  }
  0x1e   : > { %458 = vsyncadd (%p290_p11), [#allocation5], 4294963200  ;;  %s132_s5 = sand.u32 1, %s469_s14   ;;  %s265_s6 = sshll.u32 %s477_s16, 5 }
  0x1f   : > { %s264_s7 = sshll.u32 %s132_s5, 6  ;;  %s487_s9 = smov 0  }
  0x20   : > { %s134_s8 = scalar_lea.vmem [#allocation7], %s264_s7 }
  0x21 LB: >> { %s145_s10 = sadd.s32 %s489_s9, %s265_s6  ;;  %s149_s12 = scalar_lea.vmem %s134_s8, %s489_s9 [#allocation7]  ;;  %s489_s9 = sphi %s487_s9, %s144_s9  }
  0x22   : >> { %s146_s11 = sld [smem:[#allocation3 + %s145_s10]]  ;;  %s144_s9 = sadd.s32 1, %s489_s9  }
  0x23   : >> { %p141_p0 = scmp.ge.s32.totalorder %s144_s9, 32  }
  0x24   : > { %s275_s19 = sshll.u32 (%p141_p0), %s477_s16, 6  ;;  %s175_s27 = sshll.u32 (%p141_p0), %s134_s8, 4  ;;  %s176_s27 = int_to_ptr.vmem [resolvable:$true] %s175_s27 }
  0x25   : > { %s174_s26 = scalar_lea.hbm (%p141_p0), %s617_s2, %s275_s19  ;;  %s161_s29 = scalar_lea.sflag (%p141_p0), [#allocation6], %s132_s5 }
  0x26   : > { %143 = sbr.rel (!%p141_p0) target bundleno = 33 (0x21), region = 71  ;;  %s177_s28 = sshll.u32 (%p141_p0), %s174_s26, 4  ;;  %s178_s28 = int_to_ptr.hbm [resolvable:$true] %s177_s28 }
  0x27   : > { %s411_s30 = sshra.s32 (%p141_p0), %s178_s28, 4  ;;  %s417_s6 = scalar_lea.hbm (%p141_p0), %s617_s2, 128  ;;  %s412_s30 = int_to_ptr.hbm [resolvable:$true] %s411_s30 }
  0x28   : >> { %s147_s18 = scalar_lea.vmem [#allocation4], %s146_s11  ;;  %s413_s3 = scalar_lea.hbm (%p141_p0), %s412_s30, 64 }
  0x29   : >> { %v148_v0 = vld [vmem:[%s147_s18] sm:$0x1]  ;;  %p414_p1 = scmp.ne.s32.totalorder (%p141_p0), %s412_s30, %s413_s3  ;;  %p418_p5 = scmp.lt.s32.totalorder (%p141_p0), %s412_s30, %s617_s2 }
  0x2a   : >> { %150 = vst [vmem:[%s149_s12] sm:$0x1] %v148_v0  ;;  %p419_p6 = scmp.lt.s32.totalorder (%p141_p0), %s417_s6, %s413_s3 }
  0x2b   : > { %p415_p2 = pnand %p414_p1, %p555_p4 }
  0x2c   : > { %p420_p7 = por %p419_p6, %p418_p5 }
  0x2d   : > { %p416_p3 = pneg %p415_p2 }
  0x2f   : > { %p421_p9 = pnand %p420_p7, %p416_p3 }
  0x31   : > { %v151_v1 = vld [vmem:[%s134_s8] sm:$0xff]  ;;  %v152_v2 = vld [vmem:[%s134_s8 + $0x8] sm:$0xff]  ;;  %v153_v3 = vld [vmem:[%s134_s8 + $0x10] sm:$0xff] }
  0x32   : > { %266 = vst [vmem:[%s134_s8 + $0x20] sm:$0xff] %v151_v1  ;;  %v154_v4 = vld [vmem:[%s134_s8 + $0x18] sm:$0xff] }
  0x33   : > { %267 = vst [vmem:[%s134_s8 + $0x28] sm:$0xff] %v152_v2 }
  0x34   : > { %268 = vst [vmem:[%s134_s8 + $0x30] sm:$0xff] %v153_v3 }
  0x35   : > { %269 = vst [vmem:[%s134_s8 + $0x38] sm:$0xff] %v154_v4 }
  0x36   : > { %424 = shalt.err (!%p421_p9)
}
  0x37   : > { %s495_s5 = smov 128   ;;  %s496_s8 = smov 8  }
  0x38   : > { %280 = dma.vmem_to_hbm [thread:$0]  (%p555_p4), %s176_s27, 1024, %s178_s28, %s161_s29, %s495_s5, %s495_s5, %s496_s8  }
  0x39 PF: > { %p292_p10 = scmp.ge.s32.totalorder %s485_s0, 2  ;;  %s192_s10 = sand.u32 1, %s465_s13  }
  0x3a   : > { %s193_s11 = scalar_lea.sflag [#allocation6], %s192_s10 }
  0x3b   : > { %p287_p11 = pnand %p292_p10, %p562_p8 }
  0x3d   : > { %p288_p12 = pneg %p287_p11 }
  0x3f   : > { %460 = dma.done.wait (%p288_p12), %s193_s11, 1024  }
  0x40   : > { %462 = vsyncadd (%p288_p12), %s193_s11, 4294966272  ;;  %s24_s0 = sadd.s32 1, %s485_s0   ;;  %s620_s13 = smov %s469_s14 }
  0x41   : > { %p21_p13 = scmp.ge.s32.totalorder %s24_s0, 4   ;;  %s621_s14 = smov %s473_s15 }
  0x42   : > { %s622_s15 = smov %s568_s25  ;;  %s623_s16 = smov %s481_s17 }
  0x43   : > { %s624_s17 = smov %s626_s20  ;;  %23 = sbr.rel (!%p21_p13) target bundleno = 11 (0xb), region = 82 }
  0x48   :  { %199 = vsyncpa [#allocation5], 1 }
  0x49   :  { %201 = vsyncpa [#allocation5 + $0x1], 1 }
  0x4a   :  { %202 = vsyncpa [#allocation6], 1 }
  0x4b   :  { %204 = vsyncpa [#allocation6 + $0x1], 1 }

</bundles_post_ra>
